<compile_context>
chip_gen: v7x
topology: tpu7x:2x2x1
jax: 0.10.0
libtpu: 0.0.40
codegen_flags: <defaults>
</compile_context>

<pallas_src>
import math

import jax
import jax.numpy as jnp
import numpy as np
from jax.experimental import pallas as pl
from jax.experimental.pallas import tpu as pltpu

_LANE = 128
_SUBLANE = 8
_TILE_BYTES_CAP = 4 * 1024 * 1024     # ~4 MiB blocks: measured >=85% of HBM roofline
_TL_ELEMS_CAP = 8192                  # lane-axis tile cap (elements)
_VMEM_CEILING = 48 * 1024 * 1024      # stay well under v7x's 64 MiB physical VMEM


# ---------------------------------------------------------------------------
# Phase 1 (streaming): per-(n, c) row sum / max / min over raw x.
# x is laid out (N*C, HW); grid = (row blocks, lane steps), lane axis last.
# Each (TR, TL) block is folded into (TR, 128) partials with VPU-only ops;
# the single cross-lane reduce per row block happens on the last lane step.
# ---------------------------------------------------------------------------
def _row_stats_stream_kernel(x_ref, sum_ref, max_ref, min_ref,
                             acc_s_ref, acc_mx_ref, acc_mn_ref):
    l = pl.program_id(1)
    last = pl.num_programs(1) - 1
    tl = x_ref.shape[1]

    # Fold this block's lanes down to 128 lanes: pure VPU elementwise work,
    # each loaded 128-lane stripe of x is reused for all three stats.
    s = x_ref[:, 0:_LANE]
    mx = s
    mn = s
    for g in range(1, tl // _LANE):
        xg = x_ref[:, g * _LANE:(g + 1) * _LANE]
        s = s + xg
        mx = jnp.maximum(mx, xg)
        mn = jnp.minimum(mn, xg)

    @pl.when(l == 0)
    def _():
        acc_s_ref[...] = s
        acc_mx_ref[...] = mx
        acc_mn_ref[...] = mn

    @pl.when(l > 0)
    def _():
        acc_s_ref[...] = acc_s_ref[...] + s
        acc_mx_ref[...] = jnp.maximum(acc_mx_ref[...], mx)
        acc_mn_ref[...] = jnp.minimum(acc_mn_ref[...], mn)

    # One cross-lane (XLU) reduce and one lane-sparse store per row block.
    @pl.when(l == last)
    def _():
        sum_ref[...] = jnp.sum(acc_s_ref[...], axis=1, keepdims=True)
        max_ref[...] = jnp.max(acc_mx_ref[...], axis=1, keepdims=True)
        min_ref[...] = jnp.min(acc_mn_ref[...], axis=1, keepdims=True)


# Fallback when HW is not a multiple of 128: the lane block is the full HW
# extent (always a legal block), so there is only one lane step per row block
# and a direct reduce is already minimal.
def _row_stats_simple_kernel(x_ref, sum_ref, max_ref, min_ref):
    x = x_ref[...]
    sum_ref[...] = jnp.sum(x, axis=1, keepdims=True)
    max_ref[...] = jnp.max(x, axis=1, keepdims=True)
    min_ref[...] = jnp.min(x, axis=1, keepdims=True)


# ---------------------------------------------------------------------------
# Phase 2: lane-dense apply of y = a * (x - mean), a = gamma/scale per row.
# a_ref / m_ref are (TR, 1) per-row blocks broadcast along the lane axis.
# ---------------------------------------------------------------------------
def _apply_norm_kernel(x_ref, a_ref, m_ref, y_ref):
    y_ref[...] = (x_ref[...] - m_ref[...]) * a_ref[...]


def _largest_tile(extent, unit, cap):
    """Largest multiple of `unit` that divides `extent` and is <= cap (None if none)."""
    if extent < unit or extent % unit != 0:
        return None
    t = min(cap, extent)
    t -= t % unit
    while t >= unit:
        if extent % t == 0:
            return t
        t -= unit
    return None


@jax.jit
def range_batch_norm_2d(x_nchw, gamma, moving_mean, moving_var, momentum=0.9):
    """Training-mode RangeBatchNorm2d forward.

    Returns (y, new_moving_mean, new_moving_var)."""
    N, C, H, W = x_nchw.shape
    if N < 2:
        raise ValueError("RangeBatchNorm2d needs batch >= 2 (reference divides by "
                         "sqrt(2*ln(batch)), which is 0 for batch == 1).")
    HW = H * W
    NC = N * C

    # Rows ordered r = n*C + c. Pad the row count to a sublane multiple so the
    # row tile never falls back to a single oversized full-extent block.
    NCp = ((NC + _SUBLANE - 1) // _SUBLANE) * _SUBLANE
    x2 = x_nchw.reshape(NC, HW).astype(jnp.float32)
    if NCp != NC:
        x2 = jnp.pad(x2, ((0, NCp - NC), (0, 0)))

    # torch constant (depends only on batch size)
    c_const = (0.5 * 0.35 * (1.0 + (math.pi * math.log(4.0)) ** 0.5)
               / (2.0 * math.log(N)) ** 0.5)

    # ---- tile selection ------------------------------------------------------
    tl = _largest_tile(HW, _LANE, _TL_ELEMS_CAP)
    if tl is None:
        tl = HW                                   # full-extent lane block (legal)
    tr_cap_bytes = max(_SUBLANE, _TILE_BYTES_CAP // (tl * 4))
    # Keep >= 2 row blocks when the row count allows it so v7x's 2 TCs both run.
    tr_cap_mc = NCp // 2 if NCp >= 2 * _SUBLANE else NCp
    tr = _largest_tile(NCp, _SUBLANE, min(tr_cap_bytes, tr_cap_mc)) or _SUBLANE

    tile_bytes = tr * tl * 4
    vmem_need = 4 * tile_bytes + (2 << 20)        # phase-2: 2x in + 2x out buffers
    if vmem_need > _VMEM_CEILING:
        raise ValueError(
            f"RangeBatchNorm2d block ({tr}x{tl} f32) needs ~{vmem_need >> 20} MiB "
            f"of VMEM, above the {_VMEM_CEILING >> 20} MiB (v7x-safe) budget.")
    vmem_limit = int(min(max(vmem_need, 32 << 20), _VMEM_CEILING))

    n_row_blocks = NCp // tr
    stat_shape = jax.ShapeDtypeStruct((NCp, 1), jnp.float32)
    cost1 = pl.CostEstimate(flops=3 * NCp * HW, transcendentals=0,
                            bytes_accessed=(NCp * HW + 3 * NCp) * 4)

    # ---- phase 1: per-(n, c) row sum / max / min of raw x -------------------
    if tl % _LANE == 0:
        stat_spec = pl.BlockSpec((tr, 1), lambda r, l: (r, 0))
        row_sum, row_max, row_min = pl.pallas_call(
            _row_stats_stream_kernel,
            grid=(n_row_blocks, HW // tl),
            in_specs=[pl.BlockSpec((tr, tl), lambda r, l: (r, l))],
            out_specs=(stat_spec, stat_spec, stat_spec),
            out_shape=(stat_shape, stat_shape, stat_shape),
            scratch_shapes=[pltpu.VMEM((tr, _LANE), jnp.float32)] * 3,
            compiler_params=pltpu.CompilerParams(
                dimension_semantics=("parallel", "arbitrary"),
                vmem_limit_bytes=vmem_limit),
            cost_estimate=cost1,
        )(x2)
    else:
        stat_spec = pl.BlockSpec((tr, 1), lambda r: (r, 0))
        row_sum, row_max, row_min = pl.pallas_call(
            _row_stats_simple_kernel,
            grid=(n_row_blocks,),
            in_specs=[pl.BlockSpec((tr, HW), lambda r: (r, 0))],
            out_specs=(stat_spec, stat_spec, stat_spec),
            out_shape=(stat_shape, stat_shape, stat_shape),
            compiler_params=pltpu.CompilerParams(
                dimension_semantics=("parallel",),
                vmem_limit_bytes=vmem_limit),
            cost_estimate=cost1,
        )(x2)

    # ---- tiny O(N*C) finalize (per-channel math, no full-tensor work) -------
    row_sum = row_sum[:NC].reshape(N, C)
    row_max = row_max[:NC].reshape(N, C)
    row_min = row_min[:NC].reshape(N, C)

    mean_c = row_sum.sum(axis=0) * (1.0 / float(N * HW))            # (C,)

    # max/min(x - mean_c) == max/min(x) - mean_c (fp subtraction is monotone)
    rmax = row_max - mean_c[None, :]                                # (N, C)
    rmin = row_min - mean_c[None, :]

    # torch's rang.reshape(C, -1): flat (n*C + c) row stats regrouped as (C, N).
    gmax = rmax.reshape(C, N).max(axis=1)                           # (C,)
    gmin = rmin.reshape(C, N).min(axis=1)
    scale_c = c_const * (gmax - gmin)                               # (C,)

    gamma_c = gamma.reshape(C).astype(jnp.float32)
    a_c = gamma_c / scale_c                                         # gamma / scale
    a_row = jnp.tile(a_c, (N,))                                     # row r -> a_c[r % C]
    mean_row = jnp.tile(mean_c, (N,))                               # row r -> mean_c[r % C]
    if NCp != NC:
        a_row = jnp.pad(a_row, (0, NCp - NC))
        mean_row = jnp.pad(mean_row, (0, NCp - NC))
    a_row = a_row.reshape(NCp, 1)
    mean_row = mean_row.reshape(NCp, 1)

    # ---- phase 2: gridded, lane-dense apply of y = a * (x - mean) -----------
    cost2 = pl.CostEstimate(flops=2 * NCp * HW, transcendentals=0,
                            bytes_accessed=2 * NCp * HW * 4)
    y2 = pl.pallas_call(
        _apply_norm_kernel,
        grid=(n_row_blocks, HW // tl),
        in_specs=[
            pl.BlockSpec((tr, tl), lambda r, l: (r, l)),
            pl.BlockSpec((tr, 1), lambda r, l: (r, 0)),
            pl.BlockSpec((tr, 1), lambda r, l: (r, 0)),
        ],
        out_specs=pl.BlockSpec((tr, tl), lambda r, l: (r, l)),
        out_shape=jax.ShapeDtypeStruct((NCp, HW), jnp.float32),
        compiler_params=pltpu.CompilerParams(
            dimension_semantics=("parallel", "parallel"),
            vmem_limit_bytes=vmem_limit),
        cost_estimate=cost2,
    )(x2, a_row, mean_row)

    y = y2[:NC].reshape(N, C, H, W)

    new_mm = (momentum * moving_mean.astype(jnp.float32)
              + (1.0 - momentum) * mean_c.reshape(1, C, 1, 1))
    new_mv = (momentum * moving_var.astype(jnp.float32)
              + (1.0 - momentum) * scale_c.reshape(1, C, 1, 1))
    return y, new_mm, new_mv


def _reference(x, gamma, mm, mv, momentum=0.9):
    """Pure-JAX transcription of the PyTorch training-branch forward."""
    N, C = x.shape[0], x.shape[1]
    c = 0.5 * 0.35 * (1.0 + (math.pi * math.log(4.0)) ** 0.5) / (2.0 * math.log(N)) ** 0.5
    mean = x.mean(axis=(0, 2, 3), keepdims=True)
    rang = x - mean
    r2 = rang.reshape(C, -1)
    var = r2.max(axis=1).reshape(1, C, 1, 1) - r2.min(axis=1).reshape(1, C, 1, 1)
    scale = c * var
    x_hat = (x - mean) / scale
    y = gamma * x_hat
    new_mm = momentum * mm + (1.0 - momentum) * mean
    new_mv = momentum * mv + (1.0 - momentum) * scale
    return y, new_mm, new_mv


if __name__ == "__main__":
    key = jax.random.PRNGKey(0)
    N, C, H, W = 2, 4, 16, 16
    x = jax.random.normal(key, (N, C, H, W), dtype=jnp.float32)

    # Parameters per RangeBatchNorm2d.__init__ (deterministic).
    gamma = jnp.ones((1, C, 1, 1), dtype=jnp.float32)
    # beta exists in the module but is never used in its forward -> omitted.
    moving_mean = jnp.zeros((1, C, 1, 1), dtype=jnp.float32)
    moving_var = jnp.ones((1, C, 1, 1), dtype=jnp.float32)

    y, new_mm, new_mv = range_batch_norm_2d(x, gamma, moving_mean, moving_var,
                                            momentum=0.9)
    jax.block_until_ready((y, new_mm, new_mv))

    y_ref, mm_ref, mv_ref = _reference(x, gamma, moving_mean, moving_var, momentum=0.9)
    np.testing.assert_allclose(np.asarray(y), np.asarray(y_ref), rtol=1e-4, atol=1e-5)
    np.testing.assert_allclose(np.asarray(new_mm), np.asarray(mm_ref), rtol=1e-4, atol=1e-6)
    np.testing.assert_allclose(np.asarray(new_mv), np.asarray(mv_ref), rtol=1e-4, atol=1e-6)

    print("KERNEL_OK")
</pallas_src>

<mosaic_0001>
module attributes {stable_mosaic.version = 11 : i64} {
  func.func @_row_stats_stream_kernel(%arg0: i32, %arg1: i32, %arg2: memref<8x256xf32, #tpu.memory_space<vmem>>, %arg3: memref<8x1xf32, #tpu.memory_space<vmem>>, %arg4: memref<8x1xf32, #tpu.memory_space<vmem>>, %arg5: memref<8x1xf32, #tpu.memory_space<vmem>>, %arg6: memref<8x128xf32, #tpu.memory_space<vmem>>, %arg7: memref<8x128xf32, #tpu.memory_space<vmem>>, %arg8: memref<8x128xf32, #tpu.memory_space<vmem>>) attributes {dimension_semantics = [#tpu.dimension_semantics<parallel>, #tpu.dimension_semantics<arbitrary>], iteration_bounds = array<i64: 1, 1>, scalar_prefetch = 0 : i64, scratch_operands = 3 : i64, tpu.core_type = #tpu.core_type<tc>, window_params = [{transform_indices = @transform_0, window_bounds = array<i64: 8, 256>}, {transform_indices = @transform_1, window_bounds = array<i64: 8, 1>}, {transform_indices = @transform_2, window_bounds = array<i64: 8, 1>}, {transform_indices = @transform_3, window_bounds = array<i64: 8, 1>}]} {
    %c0 = arith.constant 0 : index
    %c0_0 = arith.constant 0 : index
    %0 = vector.load %arg2[%c0, %c0_0] : memref<8x256xf32, #tpu.memory_space<vmem>>, vector<8x128xf32>
    %c0_1 = arith.constant 0 : index
    %c128 = arith.constant 128 : index
    %1 = vector.load %arg2[%c0_1, %c128] : memref<8x256xf32, #tpu.memory_space<vmem>>, vector<8x128xf32>
    %2 = arith.addf %0, %1 : vector<8x128xf32>
    %3 = arith.maximumf %0, %1 : vector<8x128xf32>
    %4 = arith.minimumf %0, %1 : vector<8x128xf32>
    %c0_i32 = arith.constant 0 : i32
    %5 = arith.cmpi eq, %arg1, %c0_i32 : i32
    %6 = arith.extui %5 : i1 to i32
    %c0_i32_2 = arith.constant 0 : i32
    %7 = arith.cmpi ne, %6, %c0_i32_2 : i32
    scf.if %7 {
      %c0_7 = arith.constant 0 : index
      %c0_8 = arith.constant 0 : index
      %14 = vector.load %arg6[%c0_7, %c0_8] : memref<8x128xf32, #tpu.memory_space<vmem>>, vector<8x128xf32>
      tpu.vector_store %arg6[%c0_7, %c0_8], %2 {strides = array<i32>} : memref<8x128xf32, #tpu.memory_space<vmem>>, vector<8x128xf32>,
      %c0_9 = arith.constant 0 : index
      %c0_10 = arith.constant 0 : index
      %15 = vector.load %arg7[%c0_9, %c0_10] : memref<8x128xf32, #tpu.memory_space<vmem>>, vector<8x128xf32>
      tpu.vector_store %arg7[%c0_9, %c0_10], %3 {strides = array<i32>} : memref<8x128xf32, #tpu.memory_space<vmem>>, vector<8x128xf32>,
      %c0_11 = arith.constant 0 : index
      %c0_12 = arith.constant 0 : index
      %16 = vector.load %arg8[%c0_11, %c0_12] : memref<8x128xf32, #tpu.memory_space<vmem>>, vector<8x128xf32>
      tpu.vector_store %arg8[%c0_11, %c0_12], %4 {strides = array<i32>} : memref<8x128xf32, #tpu.memory_space<vmem>>, vector<8x128xf32>,
    } else {
    }
    %c0_i32_3 = arith.constant 0 : i32
    %8 = arith.cmpi sgt, %arg1, %c0_i32_3 : i32
    %9 = arith.extui %8 : i1 to i32
    %c0_i32_4 = arith.constant 0 : i32
    %10 = arith.cmpi ne, %9, %c0_i32_4 : i32
    scf.if %10 {
      %c0_7 = arith.constant 0 : index
      %c0_8 = arith.constant 0 : index
      %14 = vector.load %arg6[%c0_7, %c0_8] : memref<8x128xf32, #tpu.memory_space<vmem>>, vector<8x128xf32>
      %15 = arith.addf %14, %2 : vector<8x128xf32>
      %c0_9 = arith.constant 0 : index
      %c0_10 = arith.constant 0 : index
      %16 = vector.load %arg6[%c0_9, %c0_10] : memref<8x128xf32, #tpu.memory_space<vmem>>, vector<8x128xf32>
      tpu.vector_store %arg6[%c0_9, %c0_10], %15 {strides = array<i32>} : memref<8x128xf32, #tpu.memory_space<vmem>>, vector<8x128xf32>,
      %c0_11 = arith.constant 0 : index
      %c0_12 = arith.constant 0 : index
      %17 = vector.load %arg7[%c0_11, %c0_12] : memref<8x128xf32, #tpu.memory_space<vmem>>, vector<8x128xf32>
      %18 = arith.maximumf %17, %3 : vector<8x128xf32>
      %c0_13 = arith.constant 0 : index
      %c0_14 = arith.constant 0 : index
      %19 = vector.load %arg7[%c0_13, %c0_14] : memref<8x128xf32, #tpu.memory_space<vmem>>, vector<8x128xf32>
      tpu.vector_store %arg7[%c0_13, %c0_14], %18 {strides = array<i32>} : memref<8x128xf32, #tpu.memory_space<vmem>>, vector<8x128xf32>,
      %c0_15 = arith.constant 0 : index
      %c0_16 = arith.constant 0 : index
      %20 = vector.load %arg8[%c0_15, %c0_16] : memref<8x128xf32, #tpu.memory_space<vmem>>, vector<8x128xf32>
      %21 = arith.minimumf %20, %4 : vector<8x128xf32>
      %c0_17 = arith.constant 0 : index
      %c0_18 = arith.constant 0 : index
      %22 = vector.load %arg8[%c0_17, %c0_18] : memref<8x128xf32, #tpu.memory_space<vmem>>, vector<8x128xf32>
      tpu.vector_store %arg8[%c0_17, %c0_18], %21 {strides = array<i32>} : memref<8x128xf32, #tpu.memory_space<vmem>>, vector<8x128xf32>,
    } else {
    }
    %c0_i32_5 = arith.constant 0 : i32
    %11 = arith.cmpi eq, %arg1, %c0_i32_5 : i32
    %12 = arith.extui %11 : i1 to i32
    %c0_i32_6 = arith.constant 0 : i32
    %13 = arith.cmpi ne, %12, %c0_i32_6 : i32
    scf.if %13 {
      %c0_7 = arith.constant 0 : index
      %c0_8 = arith.constant 0 : index
      %14 = vector.load %arg6[%c0_7, %c0_8] : memref<8x128xf32, #tpu.memory_space<vmem>>, vector<8x128xf32>
      %cst = arith.constant dense<0.000000e+00> : vector<8xf32>
      %15 = vector.multi_reduction <add>, %14, %cst [1] : vector<8x128xf32> to vector<8xf32>
      %16 = vector.shape_cast %15 : vector<8xf32> to vector<8x1xf32>
      %c0_9 = arith.constant 0 : index
      %c0_10 = arith.constant 0 : index
      %17 = vector.load %arg3[%c0_9, %c0_10] : memref<8x1xf32, #tpu.memory_space<vmem>>, vector<8x1xf32>
      tpu.vector_store %arg3[%c0_9, %c0_10], %16 {strides = array<i32>} : memref<8x1xf32, #tpu.memory_space<vmem>>, vector<8x1xf32>,
      %c0_11 = arith.constant 0 : index
      %c0_12 = arith.constant 0 : index
      %18 = vector.load %arg7[%c0_11, %c0_12] : memref<8x128xf32, #tpu.memory_space<vmem>>, vector<8x128xf32>
      %cst_13 = arith.constant dense<0xFF800000> : vector<8xf32>
      %19 = vector.multi_reduction <maximumf>, %18, %cst_13 [1] : vector<8x128xf32> to vector<8xf32>
      %20 = vector.shape_cast %19 : vector<8xf32> to vector<8x1xf32>
      %c0_14 = arith.constant 0 : index
      %c0_15 = arith.constant 0 : index
      %21 = vector.load %arg4[%c0_14, %c0_15] : memref<8x1xf32, #tpu.memory_space<vmem>>, vector<8x1xf32>
      tpu.vector_store %arg4[%c0_14, %c0_15], %20 {strides = array<i32>} : memref<8x1xf32, #tpu.memory_space<vmem>>, vector<8x1xf32>,
      %c0_16 = arith.constant 0 : index
      %c0_17 = arith.constant 0 : index
      %22 = vector.load %arg8[%c0_16, %c0_17] : memref<8x128xf32, #tpu.memory_space<vmem>>, vector<8x128xf32>
      %cst_18 = arith.constant dense<0x7F800000> : vector<8xf32>
      %23 = vector.multi_reduction <minimumf>, %22, %cst_18 [1] : vector<8x128xf32> to vector<8xf32>
      %24 = vector.shape_cast %23 : vector<8xf32> to vector<8x1xf32>
      %c0_19 = arith.constant 0 : index
      %c0_20 = arith.constant 0 : index
      %25 = vector.load %arg5[%c0_19, %c0_20] : memref<8x1xf32, #tpu.memory_space<vmem>>, vector<8x1xf32>
      tpu.vector_store %arg5[%c0_19, %c0_20], %24 {strides = array<i32>} : memref<8x1xf32, #tpu.memory_space<vmem>>, vector<8x1xf32>,
    } else {
    }
    return
  }
  func.func @transform_0(%arg0: i32, %arg1: i32) -> (i32, i32) {
    %c0_i32 = arith.constant 0 : i32
    return %arg0, %arg1 : i32, i32
  }
  func.func @transform_1(%arg0: i32, %arg1: i32) -> (i32, i32) {
    %c0_i32 = arith.constant 0 : i32
    %c0_i32_0 = arith.constant 0 : i32
    return %arg0, %c0_i32 : i32, i32
  }
  func.func @transform_2(%arg0: i32, %arg1: i32) -> (i32, i32) {
    %c0_i32 = arith.constant 0 : i32
    %c0_i32_0 = arith.constant 0 : i32
    return %arg0, %c0_i32 : i32, i32
  }
  func.func @transform_3(%arg0: i32, %arg1: i32) -> (i32, i32) {
    %c0_i32 = arith.constant 0 : i32
    %c0_i32_0 = arith.constant 0 : i32
    return %arg0, %c0_i32 : i32, i32
  }
}

module attributes {stable_mosaic.version = 11 : i64} {
  func.func @_apply_norm_kernel(%arg0: i32, %arg1: i32, %arg2: memref<8x256xf32, #tpu.memory_space<vmem>>, %arg3: memref<8x1xf32, #tpu.memory_space<vmem>>, %arg4: memref<8x1xf32, #tpu.memory_space<vmem>>, %arg5: memref<8x256xf32, #tpu.memory_space<vmem>>) attributes {dimension_semantics = [#tpu.dimension_semantics<parallel>, #tpu.dimension_semantics<parallel>], iteration_bounds = array<i64: 1, 1>, scalar_prefetch = 0 : i64, scratch_operands = 0 : i64, tpu.core_type = #tpu.core_type<tc>, window_params = [{transform_indices = @transform_0, window_bounds = array<i64: 8, 256>}, {transform_indices = @transform_1, window_bounds = array<i64: 8, 1>}, {transform_indices = @transform_2, window_bounds = array<i64: 8, 1>}, {transform_indices = @transform_3, window_bounds = array<i64: 8, 256>}]} {
    %c0 = arith.constant 0 : index
    %c0_0 = arith.constant 0 : index
    %0 = vector.load %arg2[%c0, %c0_0] : memref<8x256xf32, #tpu.memory_space<vmem>>, vector<8x256xf32>
    %c0_1 = arith.constant 0 : index
    %c0_2 = arith.constant 0 : index
    %1 = vector.load %arg4[%c0_1, %c0_2] : memref<8x1xf32, #tpu.memory_space<vmem>>, vector<8x1xf32>
    %2 = vector.broadcast %1 : vector<8x1xf32> to vector<8x256xf32>
    %3 = arith.subf %0, %2 : vector<8x256xf32>
    %c0_3 = arith.constant 0 : index
    %c0_4 = arith.constant 0 : index
    %4 = vector.load %arg3[%c0_3, %c0_4] : memref<8x1xf32, #tpu.memory_space<vmem>>, vector<8x1xf32>
    %5 = vector.broadcast %4 : vector<8x1xf32> to vector<8x256xf32>
    %6 = arith.mulf %3, %5 : vector<8x256xf32>
    %c0_5 = arith.constant 0 : index
    %c0_6 = arith.constant 0 : index
    %7 = vector.load %arg5[%c0_5, %c0_6] : memref<8x256xf32, #tpu.memory_space<vmem>>, vector<8x256xf32>
    tpu.vector_store %arg5[%c0_5, %c0_6], %6 {strides = array<i32>} : memref<8x256xf32, #tpu.memory_space<vmem>>, vector<8x256xf32>,
    return
  }
  func.func @transform_0(%arg0: i32, %arg1: i32) -> (i32, i32) {
    %c0_i32 = arith.constant 0 : i32
    return %arg0, %arg1 : i32, i32
  }
  func.func @transform_1(%arg0: i32, %arg1: i32) -> (i32, i32) {
    %c0_i32 = arith.constant 0 : i32
    %c0_i32_0 = arith.constant 0 : i32
    return %arg0, %c0_i32 : i32, i32
  }
  func.func @transform_2(%arg0: i32, %arg1: i32) -> (i32, i32) {
    %c0_i32 = arith.constant 0 : i32
    %c0_i32_0 = arith.constant 0 : i32
    return %arg0, %c0_i32 : i32, i32
  }
  func.func @transform_3(%arg0: i32, %arg1: i32) -> (i32, i32) {
    %c0_i32 = arith.constant 0 : i32
    return %arg0, %arg1 : i32, i32
  }
}

</mosaic_0001>

<bundles_post_ra>
// kernel: sub.13
= control target key start
LH: loop header
LB: loop body
LE: loop exit
PB: predicated region body
PF: predicated region fallthrough
CT: control target
= control target key end

     0   :  { %s22_s0 = inlined_call_operand.vmem [shape: f32[4], index: 0, kind: input, shape index: {}]   ;;  %s23_s1 = inlined_call_operand.vmem [shape: f32[2,4], index: 1, kind: output, shape index: {}]  }
   0x1   :  { %v4_v0 = vld [vmem:[%s22_s0] ss:$0 sm:$0xff] }
   0x2   :  { %5 = vst [vmem:[%s23_s1] sm:$0x3] %v4_v0 }

// kernel: tile.0
= control target key start
LH: loop header
LB: loop body
LE: loop exit
PB: predicated region body
PF: predicated region fallthrough
CT: control target
= control target key end

     0   :  { %s34_s8 = smov 125   ;;  %vm7_vm0 = vcmask 7168   ;;  %s35_s11 = smov 126   ;;  %s61_s0 = inlined_call_operand.vmem [shape: f32[2,4], index: 0, kind: input, shape index: {}]   ;;  %s62_s1 = inlined_call_operand.vmem [shape: f32[8,1], index: 1, kind: output, shape index: {}]  }
   0x1   :  { %v4_v0 = vld [vmem:[%s61_s0] sm:$0x3]  ;;  %s33_s0 = smov 127  }
   0x2   :  { %5 = vst [vmem:[#allocation0] sm:$0x3] %v4_v0 }
   0x9   :  { %v9_v1 = vld [vmem:[#allocation0] sm:$0x3]  }
   0xa   :  { %v21_v2 = vld [vmem:[#allocation0] sm:$0x3]   ;;  %10 = vrot.lane.b32.xlu0 %v9_v1, %s33_s0 }
   0xb   :  { %22 = vrot.lane.b32.xlu1 %v21_v2, %s34_s8  ;;  %v6_v3 = vld [vmem:[#allocation0] sm:$0x3]  }
   0xc   :  { %v15_v4 = vld [vmem:[#allocation0] sm:$0x3]   ;;  %8 = vst.msk [vmem:[%s62_s1] ss:$4 sm:$0x3] %vm7_vm0, %v6_v3  }
   0xe   :  { %16 = vrot.lane.b32.xlu0 %v15_v4, %s35_s11 }
  0x7c   :  { %v11_v5 = vpop.permute.xlu0 %10  }
  0x7d   :  { %v23_v6 = vpop.permute.xlu1 %22   ;;  %27 = vst.msk [vmem:[%s62_s1 + $0x1] ss:$4 sm:$0x3] %vm7_vm0, %v11_v5  }
  0x7e   :  { %29 = vst.msk [vmem:[%s62_s1 + $0x3] ss:$4 sm:$0x3] %vm7_vm0, %v23_v6  }
  0x80   :  { %v17_v7 = vpop.permute.xlu0 %16  }
  0x81   :  { %28 = vst.msk [vmem:[%s62_s1 + $0x2] ss:$4 sm:$0x3] %vm7_vm0, %v17_v7  }

// kernel: range_batch_norm_2d.2
= control target key start
LH: loop header
LB: loop body
LE: loop exit
PB: predicated region body
PF: predicated region fallthrough
CT: control target
= control target key end

     0   :  { %vm42_vm0 = vcmask 7168   ;;  %s99_s0 = inlined_call_operand.vmem [shape: f32[8,256], index: 0, kind: input, shape index: {}]   ;;  %s100_s1 = inlined_call_operand.vmem [shape: f32[8,1], index: 1, kind: output, shape index: {0}]   ;;  %s101_s3 = inlined_call_operand.vmem [shape: f32[8,1], index: 3, kind: output, shape index: {2}]   ;;  %s102_s2 = inlined_call_operand.vmem [shape: f32[8,1], index: 2, kind: output, shape index: {1}]  }
   0x1   :  { %v11_v0 = vld [vmem:[%s99_s0] sm:$0xff]  ;;  %v12_v1 = vld [vmem:[%s99_s0 + $0x8] sm:$0xff] }
   0x2   :  { %v13_v2 = vadd.f32 %v12_v1, %v11_v0  ;;  %v15_v3 = vmin.f32 %v11_v0, %v12_v1  ;;  %v14_v4 = vmax.f32 %v11_v0, %v12_v1 }
   0x4   :  { %40 = vadd.xlane.f32.xlu0 %v13_v2  ;;  %49 = vmin.xlane.f32.xlu1 %v15_v3 }
   0x8   :  { %45 = vmax.xlane.f32.xlu0 %v14_v4 }
  0x91   :  { %v41_v5 = vpop.xlane.xlu0 %40  ;;  %v50_v6 = vpop.xlane.xlu1 %49 }
  0x92   :  { %43 = vst.msk [vmem:[%s100_s1] sm:$0xff] %vm42_vm0, %v41_v5  ;;  %51 = vst.msk [vmem:[%s101_s3] sm:$0xff] %vm42_vm0, %v50_v6 }
  0x95   :  { %v46_v7 = vpop.xlane.xlu0 %45 }
  0x96   :  { %47 = vst.msk [vmem:[%s102_s2] sm:$0xff] %vm42_vm0, %v46_v7 }

// kernel: range_batch_norm_2d.3
= control target key start
LH: loop header
LB: loop body
LE: loop exit
PB: predicated region body
PF: predicated region fallthrough
CT: control target
= control target key end

     0   :  { %v40_v0 = vmov 0   ;;  %s79_s2 = inlined_call_operand.vmem [shape: f32[8,1], index: 2, kind: input, shape index: {}]   ;;  %s80_s1 = inlined_call_operand.vmem [shape: f32[8,1], index: 1, kind: input, shape index: {}]   ;;  %s81_s0 = inlined_call_operand.vmem [shape: f32[8,256], index: 0, kind: input, shape index: {}]   ;;  %s82_s3 = inlined_call_operand.vmem [shape: f32[8,256], index: 3, kind: output, shape index: {}]  }
   0x1   :  { %39 = vset.pattern.permute.xlu0 %v40_v0  ;;  %v16_v1 = vld [vmem:[%s79_s2] sm:$0xff]  ;;  %v15_v5 = vld [vmem:[%s81_s0 + $0x8] sm:$0xff] }
   0x2   :  { %19 = vperm.xlu0 %39, %v16_v1   ;;  %v24_v2 = vld [vmem:[%s80_s1] sm:$0xff] }
   0x3   :  { %v14_v4 = vld [vmem:[%s81_s0] sm:$0xff] }
   0x6   :  { %27 = vperm.xlu0 %39, %v24_v2  }
  0x81   :  { %v20_v3 = vpop.permute.xlu0 %19 }
  0x82   :  { %v22_v6 = vsub.f32 %v14_v4, %v20_v3  ;;  %v23_v7 = vsub.f32 %v15_v5, %v20_v3 }
  0x85   :  { %v28_v8 = vpop.permute.xlu0 %27 }
  0x86   :  { %v30_v9 = vmul.f32 %v28_v8, %v22_v6  ;;  %v31_v10 = vmul.f32 %v28_v8, %v23_v7 }
  0x88   :  { %32 = vst [vmem:[%s82_s3] sm:$0xff] %v30_v9  ;;  %33 = vst [vmem:[%s82_s3 + $0x8] sm:$0xff] %v31_v10 }

</bundles_post_ra>
